<compile_context>
chip_gen: v5e
topology: v5e:2x2
jax: 0.10.0
libtpu: 0.0.40
codegen_flags: <defaults>
</compile_context>

<pallas_src>
import functools

import jax
import jax.numpy as jnp
from jax import lax
from jax.experimental import pallas as pl
from jax.experimental.pallas import tpu as pltpu

LANES = 128
SUBLANES = 8
# sublane packing per itemsize: f32 -> 8, bf16 -> 16, int8/uint8 -> 32
_PACKING = {4: 8, 2: 16, 1: 32}


def _psnr_sum_kernel(a_ref, b_ref, o_ref, *, tile_rows, steps_per_core,
                     valid_rows, first_masked_blk, needs_mask,
                     fold_to_sublanes):
    c = pl.program_id(0)          # core / parallel axis
    j = pl.program_id(1)          # reduction axis (arbitrary)

    @pl.when(j == 0)
    def _():
        o_ref[...] = jnp.zeros_like(o_ref)

    # Cast in-kernel so HBM traffic stays in the native input dtype.
    a = a_ref[...].astype(jnp.float32)
    b = b_ref[...].astype(jnp.float32)
    d = a - b                      # no abs: squared anyway
    sq = d * d
    w = sq.shape[-1]

    def fold(x):
        if fold_to_sublanes:
            # Pure cross-vreg VPU adds down to one (8, w) vreg-shaped partial.
            return jnp.sum(x.reshape(tile_rows // SUBLANES, SUBLANES, w), axis=0)
        # Generic path (w not lane-aligned): cheap sublane reduce to (1, w).
        return jnp.sum(x, axis=0, keepdims=True)

    if needs_mask:
        blk = c * steps_per_core + j

        # Hot path: interior blocks accumulate with no masking work at all.
        @pl.when(blk < first_masked_blk)
        def _():
            o_ref[...] += fold(sq)[None]

        # Tail / phantom blocks: zero out rows past the real row count.  The
        # mask is applied AFTER the square so garbage (NaN/Inf) from the
        # hanging-over region is discarded by the select.
        @pl.when(blk >= first_masked_blk)
        def _():
            rid = blk * tile_rows + lax.broadcasted_iota(jnp.int32, sq.shape, 0)
            o_ref[...] += fold(jnp.where(rid < valid_rows, sq,
                                         jnp.float32(0.0)))[None]
    else:
        o_ref[...] += fold(sq)[None]


def psnr_pallas(img1, img2, *, target_block_bytes=2 << 20):
    assert img1.shape == img2.shape, "image shapes must match"
    shape = img1.shape
    n = 1
    for s in shape:
        n *= s

    # Collapse LEADING dims only (layout-preserving, zero-copy); keep the last
    # dim intact so no relayout copy is emitted upstream of the kernel.
    if len(shape) <= 1:
        a2 = img1.reshape(1, max(n, 1))
        b2 = img2.reshape(1, max(n, 1))
    else:
        rows = n // shape[-1]
        a2 = img1.reshape(rows, shape[-1])
        b2 = img2.reshape(rows, shape[-1])
    R, W = a2.shape

    itemsize = jnp.dtype(img1.dtype).itemsize
    packing = _PACKING.get(itemsize, SUBLANES)
    padded_w = ((W + LANES - 1) // LANES) * LANES   # lane-padded width

    # Row-tile so each input block is ~target_block_bytes in the NATIVE dtype,
    # rounded to the dtype's sublane packing.
    tile_rows = (target_block_bytes // (padded_w * itemsize)) // packing * packing
    tile_rows = max(packing, tile_rows)
    if tile_rows >= R:
        tile_rows = R             # full-extent block dim is always legal
    nblocks = (R + tile_rows - 1) // tile_rows
    # TODO(synk): if R is tiny but W is enormous a single (R, W) block could
    # exceed VMEM; would need lane-axis blocking, not relevant for images.

    # Split the reduction over 2 TensorCores whenever there is >1 block
    # (v7x megacore); sequential and harmless on 1-TC chips.
    ncores = 2 if nblocks >= 2 else 1
    steps_per_core = (nblocks + ncores - 1) // ncores
    total_blocks = ncores * steps_per_core
    has_phantom = total_blocks > nblocks
    needs_mask = (total_blocks * tile_rows) != R
    first_masked_blk = R // tile_rows

    fold_to_sublanes = (tile_rows % SUBLANES == 0) and (W % LANES == 0)
    acc_rows = SUBLANES if fold_to_sublanes else 1

    if has_phantom:
        # Clamp the phantom trailing block onto the last real block; its
        # contribution is zeroed in-kernel by the row mask.
        in_idx = lambda c, j: (jnp.minimum(c * steps_per_core + j, nblocks - 1), 0)
    else:
        in_idx = lambda c, j: (c * steps_per_core + j, 0)

    kernel = functools.partial(
        _psnr_sum_kernel,
        tile_rows=tile_rows,
        steps_per_core=steps_per_core,
        valid_rows=R,
        first_masked_blk=first_masked_blk,
        needs_mask=needs_mask,
        fold_to_sublanes=fold_to_sublanes,
    )

    # VMEM budget: 2 inputs x 2 pipeline buffers x (padded) block bytes,
    # plus the double-buffered f32 accumulator block, plus headroom.
    rows_pad = ((tile_rows + packing - 1) // packing) * packing
    block_bytes = rows_pad * padded_w * itemsize
    vmem_needed = 2 * 2 * block_bytes + 2 * SUBLANES * padded_w * 4
    vmem_limit = int(min(48 << 20, max(16 << 20, vmem_needed + (8 << 20))))

    partials = pl.pallas_call(
        kernel,
        out_shape=jax.ShapeDtypeStruct((ncores, acc_rows, W), jnp.float32),
        grid_spec=pltpu.PrefetchScalarGridSpec(
            num_scalar_prefetch=0,
            grid=(ncores, steps_per_core),
            in_specs=[
                pl.BlockSpec((tile_rows, W), in_idx),
                pl.BlockSpec((tile_rows, W), in_idx),
            ],
            out_specs=pl.BlockSpec((1, acc_rows, W), lambda c, j: (c, 0, 0)),
        ),
        compiler_params=pltpu.CompilerParams(
            dimension_semantics=("parallel", "arbitrary"),
            vmem_limit_bytes=vmem_limit),
        cost_estimate=pl.CostEstimate(
            flops=3 * n,
            transcendentals=0,
            bytes_accessed=2 * n * itemsize + ncores * acc_rows * W * 4),
    )(a2, b2)

    # Tiny epilogue: combine the per-core partials and finish the PSNR in XLA.
    total = jnp.sum(partials)
    mse = total / jnp.float32(n)
    return jnp.float32(10.0) * jnp.log10(jnp.float32(255.0 * 255.0) / mse)


def psnr_ref(img1, img2):
    d = jnp.abs(img1.astype(jnp.float32) - img2.astype(jnp.float32))
    mse = jnp.mean(d * d)
    return 10.0 * jnp.log10(255.0 * 255.0 / mse)


if __name__ == "__main__":
    key = jax.random.PRNGKey(0)
    k1, k2 = jax.random.split(key)
    # NCHW, like the PyTorch module's expected image inputs.
    shape = (2, 4, 16, 16)
    img1 = jax.random.uniform(k1, shape, jnp.float32, minval=0.0, maxval=255.0)
    img2 = jax.random.uniform(k2, shape, jnp.float32, minval=0.0, maxval=255.0)

    out = psnr_pallas(img1, img2)
    jax.block_until_ready(out)

    ref = psnr_ref(img1, img2)
    assert jnp.allclose(out, ref, rtol=1e-4, atol=1e-4), (out, ref)
    print("KERNEL_OK")
</pallas_src>

<mosaic_0001>
module attributes {stable_mosaic.version = 11 : i64} {
  func.func @_psnr_sum_kernel(%arg0: i32, %arg1: i32, %arg2: memref<128x16xf32, #tpu.memory_space<vmem>>, %arg3: memref<128x16xf32, #tpu.memory_space<vmem>>, %arg4: memref<1x1x16xf32, #tpu.memory_space<vmem>>) attributes {dimension_semantics = [#tpu.dimension_semantics<parallel>, #tpu.dimension_semantics<arbitrary>], iteration_bounds = array<i64: 1, 1>, scalar_prefetch = 0 : i64, scratch_operands = 0 : i64, tpu.core_type = #tpu.core_type<tc>, window_params = [{transform_indices = @transform_0, window_bounds = array<i64: 128, 16>}, {transform_indices = @transform_1, window_bounds = array<i64: 128, 16>}, {transform_indices = @transform_2, window_bounds = array<i64: 1, 1, 16>}]} {
    %c0_i32 = arith.constant 0 : i32
    %0 = arith.cmpi eq, %arg1, %c0_i32 : i32
    %1 = arith.extui %0 : i1 to i32
    %c0_i32_0 = arith.constant 0 : i32
    %2 = arith.cmpi ne, %1, %c0_i32_0 : i32
    scf.if %2 {
      %cst_10 = arith.constant 0.000000e+00 : f32
      %13 = vector.broadcast %cst_10 : f32 to vector<1x1x16xf32>
      %c0_11 = arith.constant 0 : index
      %c0_12 = arith.constant 0 : index
      %c0_13 = arith.constant 0 : index
      %14 = vector.load %arg4[%c0_11, %c0_12, %c0_13] : memref<1x1x16xf32, #tpu.memory_space<vmem>>, vector<1x1x16xf32>
      tpu.vector_store %arg4[%c0_11, %c0_12, %c0_13], %13 {strides = array<i32>} : memref<1x1x16xf32, #tpu.memory_space<vmem>>, vector<1x1x16xf32>,
    } else {
    }
    %c0 = arith.constant 0 : index
    %c0_1 = arith.constant 0 : index
    %3 = vector.load %arg2[%c0, %c0_1] : memref<128x16xf32, #tpu.memory_space<vmem>>, vector<128x16xf32>
    %c0_2 = arith.constant 0 : index
    %c0_3 = arith.constant 0 : index
    %4 = vector.load %arg3[%c0_2, %c0_3] : memref<128x16xf32, #tpu.memory_space<vmem>>, vector<128x16xf32>
    %5 = arith.subf %3, %4 : vector<128x16xf32>
    %6 = arith.mulf %5, %5 : vector<128x16xf32>
    %c0_4 = arith.constant 0 : index
    %c0_5 = arith.constant 0 : index
    %c0_6 = arith.constant 0 : index
    %7 = vector.load %arg4[%c0_4, %c0_5, %c0_6] : memref<1x1x16xf32, #tpu.memory_space<vmem>>, vector<1x1x16xf32>
    %cst = arith.constant dense<0.000000e+00> : vector<16xf32>
    %8 = vector.multi_reduction <add>, %6, %cst [0] : vector<128x16xf32> to vector<16xf32>
    %9 = vector.shape_cast %8 : vector<16xf32> to vector<1x16xf32>
    %10 = vector.shape_cast %9 : vector<1x16xf32> to vector<1x1x16xf32>
    %11 = arith.addf %7, %10 : vector<1x1x16xf32>
    %c0_7 = arith.constant 0 : index
    %c0_8 = arith.constant 0 : index
    %c0_9 = arith.constant 0 : index
    %12 = vector.load %arg4[%c0_7, %c0_8, %c0_9] : memref<1x1x16xf32, #tpu.memory_space<vmem>>, vector<1x1x16xf32>
    tpu.vector_store %arg4[%c0_7, %c0_8, %c0_9], %11 {strides = array<i32>} : memref<1x1x16xf32, #tpu.memory_space<vmem>>, vector<1x1x16xf32>,
    return
  }
  func.func @transform_0(%arg0: i32, %arg1: i32) -> (i32, i32) {
    %c1_i32 = arith.constant 1 : i32
    %0 = arith.muli %arg0, %c1_i32 : i32
    %1 = arith.addi %0, %arg1 : i32
    %c0_i32 = arith.constant 0 : i32
    %c0_i32_0 = arith.constant 0 : i32
    return %1, %c0_i32 : i32, i32
  }
  func.func @transform_1(%arg0: i32, %arg1: i32) -> (i32, i32) {
    %c1_i32 = arith.constant 1 : i32
    %0 = arith.muli %arg0, %c1_i32 : i32
    %1 = arith.addi %0, %arg1 : i32
    %c0_i32 = arith.constant 0 : i32
    %c0_i32_0 = arith.constant 0 : i32
    return %1, %c0_i32 : i32, i32
  }
  func.func @transform_2(%arg0: i32, %arg1: i32) -> (i32, i32, i32) {
    %c0_i32 = arith.constant 0 : i32
    %c0_i32_0 = arith.constant 0 : i32
    %c0_i32_1 = arith.constant 0 : i32
    return %arg0, %c0_i32, %c0_i32_0 : i32, i32, i32
  }
}

</mosaic_0001>

<bundles_post_ra>
// kernel: tpu_custom_call.1
= control target key start
LH: loop header
LB: loop body
LE: loop exit
PB: predicated region body
PF: predicated region fallthrough
CT: control target
= control target key end

     0   :  { %vm60_vm0 = vcmask 122880   ;;  %v224_v0 = vmov 0.0   ;;  %vm127_vm1 = vcmask 130048   ;;  %s358_s0 = inlined_call_operand.vmem [shape: f32[128,16], index: 0, kind: input, shape index: {}]   ;;  %s359_s1 = inlined_call_operand.vmem [shape: f32[128,16], index: 1, kind: input, shape index: {}]   ;;  %s360_s2 = inlined_call_operand.hbm [shape: f32[1,1,16], index: 2, kind: output, shape index: {}]  }
   0x1   :  { %61 = vst.msk [vmem:[#allocation2] sm:$0x1] %vm60_vm0, %v224_v0  ;;  %v62_v1 = vld [vmem:[%s358_s0] sm:$0xff]  ;;  %v63_v2 = vld [vmem:[%s358_s0 + $0x8] sm:$0xff]  ;;  %v64_v3 = vld [vmem:[%s358_s0 + $0x10] sm:$0xff] }
   0x2   :  { %v78_v4 = vld [vmem:[%s359_s1] sm:$0xff]  ;;  %v79_v5 = vld [vmem:[%s359_s1 + $0x8] sm:$0xff]  ;;  %v65_v6 = vld [vmem:[%s358_s0 + $0x18] sm:$0xff] }
   0x3   :  { %v80_v7 = vld [vmem:[%s359_s1 + $0x10] sm:$0xff]  ;;  %v81_v8 = vld [vmem:[%s359_s1 + $0x18] sm:$0xff]  ;;  %v94_v9 = vsub.f32 %v62_v1, %v78_v4  ;;  %v95_v10 = vsub.f32 %v63_v2, %v79_v5  ;;  %v66_v12 = vld [vmem:[%s358_s0 + $0x20] sm:$0xff] }
   0x4   :  { %v96_v11 = vsub.f32 %v64_v3, %v80_v7  ;;  %v82_v13 = vld [vmem:[%s359_s1 + $0x20] sm:$0xff]  ;;  %v97_v14 = vsub.f32 %v65_v6, %v81_v8  ;;  %v67_v15 = vld [vmem:[%s358_s0 + $0x28] sm:$0xff] }
   0x5   :  { %v83_v16 = vld [vmem:[%s359_s1 + $0x28] sm:$0xff]  ;;  %v110_v17 = vmul.f32 %v94_v9, %v94_v9  ;;  %v98_v18 = vsub.f32 %v66_v12, %v82_v13  ;;  %v111_v19 = vmul.f32 %v95_v10, %v95_v10 }
   0x6   :  { %v112_v20 = vmul.f32 %v96_v11, %v96_v11 }
   0x7   :  { %7 = vsyncpa [#allocation3], 0  ;;  %v68_v21 = vld [vmem:[%s358_s0 + $0x30] sm:$0xff]  ;;  %v99_v23 = vsub.f32 %v67_v15, %v83_v16  ;;  %v113_v24 = vmul.f32 %v97_v14, %v97_v14  ;;  %v69_v25 = vld [vmem:[%s358_s0 + $0x38] sm:$0xff]  ;;  %v128_v27 = vsel %vm127_vm1, %v110_v17, 0.0  ;;  %v114_v29 = vmul.f32 %v98_v18, %v98_v18  ;;  %s175_s19 = sshll.u32 %s360_s2, 4  ;;  %s176_s19 = int_to_ptr.hbm [resolvable:$true] %s175_s19 }
   0x8   :  { %v84_v22 = vld [vmem:[%s359_s1 + $0x30] sm:$0xff]  ;;  %v85_v26 = vld [vmem:[%s359_s1 + $0x38] sm:$0xff]  ;;  %v129_v30 = vsel %vm127_vm1, %v111_v19, 0.0  ;;  %v131_v31 = vsel %vm127_vm1, %v112_v20, 0.0  ;;  %v70_v32 = vld [vmem:[%s358_s0 + $0x40] sm:$0xff] }
   0x9   :  { %v100_v28 = vsub.f32 %v68_v21, %v84_v22  ;;  %v86_v33 = vld [vmem:[%s359_s1 + $0x40] sm:$0xff]  ;;  %v130_v34 = vadd.f32 %v129_v30, %v128_v27  ;;  %v101_v35 = vsub.f32 %v69_v25, %v85_v26  ;;  %v115_v36 = vmul.f32 %v99_v23, %v99_v23  ;;  %v71_v38 = vld [vmem:[%s358_s0 + $0x48] sm:$0xff]  ;;  %v72_v44 = vld [vmem:[%s358_s0 + $0x50] sm:$0xff] }
   0xa   :  { %v133_v37 = vsel %vm127_vm1, %v113_v24, 0.0  ;;  %v87_v39 = vld [vmem:[%s359_s1 + $0x48] sm:$0xff]  ;;  %v102_v41 = vsub.f32 %v70_v32, %v86_v33  ;;  %v135_v43 = vsel %vm127_vm1, %v114_v29, 0.0  ;;  %v88_v45 = vld [vmem:[%s359_s1 + $0x50] sm:$0xff]  ;;  %v73_v50 = vld [vmem:[%s358_s0 + $0x58] sm:$0xff] }
   0xb   :  { %v132_v40 = vadd.f32 %v131_v31, %v130_v34  ;;  %v116_v42 = vmul.f32 %v100_v28, %v100_v28  ;;  %v103_v47 = vsub.f32 %v71_v38, %v87_v39  ;;  %v117_v48 = vmul.f32 %v101_v35, %v101_v35  ;;  %v89_v51 = vld [vmem:[%s359_s1 + $0x58] sm:$0xff]  ;;  %v74_v56 = vld [vmem:[%s358_s0 + $0x60] sm:$0xff]  ;;  %v75_v62 = vld [vmem:[%s358_s0 + $0x68] sm:$0xff] }
   0xc   :  { %v137_v49 = vsel %vm127_vm1, %v115_v36, 0.0  ;;  %v104_v53 = vsub.f32 %v72_v44, %v88_v45  ;;  %v118_v54 = vmul.f32 %v102_v41, %v102_v41  ;;  %v90_v57 = vld [vmem:[%s359_s1 + $0x60] sm:$0xff]  ;;  %v105_v59 = vsub.f32 %v73_v50, %v89_v51  ;;  %v91_v63 = vld [vmem:[%s359_s1 + $0x68] sm:$0xff]  ;;  %v76_v4 = vld [vmem:[%s358_s0 + $0x70] sm:$0xff] }
   0xd   :  { %v134_v46 = vadd.f32 %v133_v37, %v132_v40  ;;  %v139_v55 = vsel %vm127_vm1, %v116_v42, 0.0  ;;  %v119_v60 = vmul.f32 %v103_v47, %v103_v47  ;;  %v141_v61 = vsel %vm127_vm1, %v117_v48, 0.0  ;;  %v92_v5 = vld [vmem:[%s359_s1 + $0x70] sm:$0xff]  ;;  %v77_v10 = vld [vmem:[%s358_s0 + $0x78] sm:$0xff]  ;;  %v126_v37 = vld [vmem:[#allocation2] sm:$0x1] }
   0xe   :  { %v106_v1 = vsub.f32 %v74_v56, %v90_v57  ;;  %v120_v2 = vmul.f32 %v104_v53, %v104_v53  ;;  %v143_v3 = vsel %vm127_vm1, %v118_v54, 0.0  ;;  %v107_v7 = vsub.f32 %v75_v62, %v91_v63  ;;  %v93_v11 = vld [vmem:[%s359_s1 + $0x78] sm:$0xff]  ;;  %s225_s0 = smov [#allocation2]  }
   0xf   :  { %v136_v52 = vadd.f32 %v135_v43, %v134_v46  ;;  %v121_v8 = vmul.f32 %v105_v59, %v105_v59  ;;  %v145_v9 = vsel %vm127_vm1, %v119_v60, 0.0  ;;  %v108_v13 = vsub.f32 %v76_v4, %v92_v5  ;;  %s173_s1 = sshll.u32 %s225_s0, 4  ;;  %s174_s1 = int_to_ptr.vmem [resolvable:$true] %s173_s1 }
  0x10   :  { %v122_v14 = vmul.f32 %v106_v1, %v106_v1  ;;  %v147_v15 = vsel %vm127_vm1, %v120_v2, 0.0  ;;  %v109_v17 = vsub.f32 %v77_v10, %v93_v11  ;;  %v123_v18 = vmul.f32 %v107_v7, %v107_v7 }
  0x11   :  { %v138_v58 = vadd.f32 %v137_v49, %v136_v52  ;;  %v149_v19 = vsel %vm127_vm1, %v121_v8, 0.0  ;;  %v124_v21 = vmul.f32 %v108_v13, %v108_v13 }
  0x12   :  { %v151_v22 = vsel %vm127_vm1, %v122_v14, 0.0  ;;  %v125_v24 = vmul.f32 %v109_v17, %v109_v17  ;;  %v153_v25 = vsel %vm127_vm1, %v123_v18, 0.0 }
  0x13   :  { %v140_v0 = vadd.f32 %v139_v55, %v138_v58  ;;  %v155_v27 = vsel %vm127_vm1, %v124_v21, 0.0 }
  0x14   :  { %v157_v29 = vsel %vm127_vm1, %v125_v24, 0.0 }
  0x15   :  { %v142_v6 = vadd.f32 %v141_v61, %v140_v0 }
  0x17   :  { %v144_v12 = vadd.f32 %v143_v3, %v142_v6 }
  0x19   :  { %v146_v16 = vadd.f32 %v145_v9, %v144_v12 }
  0x1b   :  { %v148_v20 = vadd.f32 %v147_v15, %v146_v16 }
  0x1d   :  { %v150_v23 = vadd.f32 %v149_v19, %v148_v20 }
  0x1f   :  { %v152_v26 = vadd.f32 %v151_v22, %v150_v23 }
  0x21   :  { %v154_v28 = vadd.f32 %v153_v25, %v152_v26 }
  0x23   :  { %v156_v30 = vadd.f32 %v155_v27, %v154_v28 }
  0x25   :  { %v158_v31 = vadd.f32 %v157_v29, %v156_v30 }
  0x27   :  { %v159_v32 = vrot.slane %v158_v31, 4 }
  0x29   :  { %v160_v33 = vadd.f32 %v159_v32, %v158_v31 }
  0x2b   :  { %v161_v34 = vrot.slane %v160_v33, 2 }
  0x2d   :  { %v162_v35 = vadd.f32 %v161_v34, %v160_v33 }
  0x2f   :  { %v163_v36 = vrot.slane %v162_v35, 1 }
  0x31   :  { %v164_v38 = vadd.f32 %v163_v36, %v162_v35 }
  0x33   :  { %v165_v39 = vadd.f32 %v164_v38, %v126_v37 }
  0x35   :  { %167 = vst.msk [vmem:[#allocation2] sm:$0x1] %vm60_vm0, %v165_v39 }
  0x36   :  { %178 = dma.vmem_to_hbm [thread:$0]  %s174_s1, 16, %s176_s19, [#allocation3]  }
  0x37   :  { %222 = dma.done.wait [#allocation3], 16  }
  0x38   :  { %223 = vsyncadd [#allocation3], 4294967280 }
  0x39   :  { %183 = vsyncpa [#allocation3], 1 }

</bundles_post_ra>
